<compile_context>
chip_gen: v7x
topology: tpu7x:2x2x1
jax: 0.10.0
libtpu: 0.0.40
codegen_flags: <defaults>
</compile_context>

<pallas_src>
import jax
import jax.numpy as jnp
from jax.experimental import pallas as pl
from jax.experimental.pallas import tpu as pltpu

LANE = 128                              # TPU lane width
ACC_ROWS = 32                           # resident accumulator rows per split (4 indep. f32 vreg chains)
CHUNK_ROWS = 2048                       # rows per in-kernel chunk (bounds f32 temporaries to ~1 MiB)
TARGET_BLOCK_BYTES = 4 * 1024 * 1024    # per-input block bytes per grid step (~8 MiB/step total)
VMEM_LIMIT_BYTES = 32 * 1024 * 1024     # 2 inputs x 2 buffers x 4 MiB = 16 MiB + headroom
                                        # (raises v5e default 16 MiB; == v6e/v7x default; < v7x 64 MiB physical)


def _round_up(a, b):
    return ((a + b - 1) // b) * b


def _num_tensorcores():
    """Best-effort TensorCores-per-chip (2 on v7x, 1 on v5e/v6e). Safe fallback = 1."""
    try:
        info = pltpu.get_tpu_info()
        for attr in ("num_cores", "core_count", "num_tensorcores", "tensorcore_count"):
            v = getattr(info, attr, None)
            if isinstance(v, int) and 1 <= v <= 8:
                return v
    except Exception:
        pass
    try:
        if "v7" in jax.devices()[0].device_kind.lower():
            return 2
    except Exception:
        pass
    return 1


def _make_mse_kernel(m_rows, tm, t_blocks, last_full, total_blocks):
    """Partial-sum kernel: each parallel split g owns one resident (32,128) f32 block."""
    emit_unmasked = last_full > 0                 # there exist guaranteed-full, unique blocks
    emit_masked = total_blocks > last_full        # there exist ragged / phantom blocks

    def _accumulate(x_ref, y_ref, out_ref, block_idx, masked):
        acc = None
        for off in range(0, tm, CHUNK_ROWS):          # static unrolled chunk loop
            rows_c = min(CHUNK_ROWS, tm - off)        # multiple of 32 by construction
            xd = x_ref[off:off + rows_c, :].astype(jnp.float32)
            yd = y_ref[off:off + rows_c, :].astype(jnp.float32)
            d = xd - yd
            if masked:
                # Zero rows past the real extent (ragged tail of the last block and
                # phantom clamped blocks, whose unclamped row index is >= m_rows).
                r = (block_idx * tm + off
                     + jax.lax.broadcasted_iota(jnp.int32, (rows_c, LANE), 0))
                d = jnp.where(r < m_rows, d, 0.0)
            sq = d * d
            # rows_c % 32 == 0, so the reshape groups whole native tiles for
            # f32/bf16/int8 and the axis-0 sum is pure VALU adds into 4 independent
            # (8,128) vreg accumulators -- no XLU / scalar chain per step.
            part = jnp.sum(sq.reshape(rows_c // ACC_ROWS, ACC_ROWS, LANE), axis=0)
            acc = part if acc is None else acc + part
        out_ref[...] += acc

    def kernel(x_ref, y_ref, out_ref):
        g = pl.program_id(0)
        t = pl.program_id(1)
        block_idx = g * t_blocks + t

        @pl.when(t == 0)
        def _():
            out_ref[...] = jnp.zeros_like(out_ref)

        if emit_unmasked and emit_masked:
            @pl.when(block_idx < last_full)
            def _():
                _accumulate(x_ref, y_ref, out_ref, block_idx, masked=False)

            @pl.when(block_idx >= last_full)
            def _():
                _accumulate(x_ref, y_ref, out_ref, block_idx, masked=True)
        elif emit_masked:
            _accumulate(x_ref, y_ref, out_ref, block_idx, masked=True)
        else:
            _accumulate(x_ref, y_ref, out_ref, block_idx, masked=False)

    return kernel


def mse_loss_pallas(x, y, reduction="mean"):
    """Pallas equivalent of torch.nn.functional.mse_loss(x, y, reduction=...)."""
    assert x.shape == y.shape, "MSELoss requires identical shapes (no broadcasting here)"
    if reduction not in ("mean", "sum"):
        # TODO(synk): reduction='none' (elementwise output) not implemented in-kernel.
        raise NotImplementedError("reduction='none' not supported")

    n = x.size
    xf = jnp.reshape(x, (-1,))
    yf = jnp.reshape(y, (-1,))

    M = n // LANE
    tail = n - M * LANE

    # <=127-element unaligned tail handled in plain JAX (no full-array pad copy).
    tail_sum = jnp.float32(0.0)
    if tail:
        xt = xf[M * LANE:].astype(jnp.float32)
        yt = yf[M * LANE:].astype(jnp.float32)
        tail_sum = jnp.sum((xt - yt) ** 2)

    if M == 0:
        total = tail_sum
    else:
        # Lane-dense [M, 128] view in native dtype; slice only when unaligned.
        x2 = (xf if tail == 0 else xf[: M * LANE]).reshape(M, LANE)
        y2 = (yf if tail == 0 else yf[: M * LANE]).reshape(M, LANE)

        dsize = max(jnp.dtype(x.dtype).itemsize, jnp.dtype(y.dtype).itemsize)
        tm_target = max(32, (TARGET_BLOCK_BYTES // (LANE * dsize)) // 32 * 32)
        tm = min(tm_target, _round_up(M, 32))     # rows per grid step
        nb = pl.cdiv(M, tm)                       # real row-blocks

        nsplit = max(1, min(_num_tensorcores(), nb))   # dual-TC split only where it helps
        t_blocks = pl.cdiv(nb, nsplit)
        total_blocks = nsplit * t_blocks
        last_full = nb if (M % tm == 0) else nb - 1    # blocks below this are full & unique

        kernel = _make_mse_kernel(M, tm, t_blocks, last_full, total_blocks)

        def in_map(g, t):
            # Clamp phantom tail blocks in-bounds; their rows are masked to 0 in-kernel.
            return (jnp.minimum(g * t_blocks + t, nb - 1), 0)

        bytes_in = (jnp.dtype(x.dtype).itemsize + jnp.dtype(y.dtype).itemsize) * M * LANE
        cost = pl.CostEstimate(
            flops=3 * M * LANE,
            transcendentals=0,
            bytes_accessed=bytes_in + nsplit * ACC_ROWS * LANE * 4,
        )

        partials = pl.pallas_call(
            kernel,
            out_shape=jax.ShapeDtypeStruct((nsplit * ACC_ROWS, LANE), jnp.float32),
            grid_spec=pltpu.PrefetchScalarGridSpec(
                num_scalar_prefetch=0,
                grid=(nsplit, t_blocks),
                in_specs=[
                    pl.BlockSpec((tm, LANE), in_map),
                    pl.BlockSpec((tm, LANE), in_map),
                ],
                out_specs=pl.BlockSpec((ACC_ROWS, LANE), lambda g, t: (g, 0)),
            ),
            compiler_params=pltpu.CompilerParams(
                dimension_semantics=("parallel", "arbitrary"),
                vmem_limit_bytes=VMEM_LIMIT_BYTES,
            ),
            cost_estimate=cost,
        )(x2, y2)

        total = jnp.sum(partials) + tail_sum   # tiny final cross-lane reduce in plain JAX

    if reduction == "mean":
        return total / jnp.float32(n)
    return total


class MSELoss:
    """Mirrors the PyTorch wrapper: running-loss bookkeeping in Python, math in Pallas."""

    def __init__(self, reduction="mean"):
        self.reduction = reduction
        self.running_dict = {"loss": 0.0}

    def __call__(self, x, y):
        loss = mse_loss_pallas(x, y, reduction=self.reduction)
        self.accumulate(loss)
        return loss

    def accumulate(self, batch_loss):
        # Keep the running sum lazy (device array); no blocking host sync per step.
        self.running_dict["loss"] = self.running_dict["loss"] + batch_loss

    def get_current_value(self, batch_n):
        n = batch_n + 1
        return float(self.running_dict["loss"]) / n

    def reset(self):
        self.running_dict = {"loss": 0.0}


if __name__ == "__main__":
    key = jax.random.PRNGKey(0)
    kx, ky = jax.random.split(key)

    # NCHW-like inputs consistent with a conv-model loss: batch=2, channels=4, 16x16 spatial.
    x = jax.random.normal(kx, (2, 4, 16, 16), dtype=jnp.float32)
    y = jax.random.normal(ky, (2, 4, 16, 16), dtype=jnp.float32)

    loss_mod = MSELoss(reduction="mean")
    loss = jax.block_until_ready(loss_mod(x, y))

    ref = jnp.mean((x - y) ** 2)
    assert abs(float(loss) - float(ref)) < 1e-5 * max(1.0, abs(float(ref))), (
        float(loss), float(ref))

    # Non-lane-aligned shape exercises the plain-JAX tail path + ragged-block masking.
    kx2, ky2 = jax.random.split(ky)
    x2 = jax.random.normal(kx2, (3, 5, 37, 21), dtype=jnp.float32)
    y2 = jax.random.normal(ky2, (3, 5, 37, 21), dtype=jnp.float32)
    loss2 = jax.block_until_ready(mse_loss_pallas(x2, y2, reduction="sum"))
    ref2 = jnp.sum((x2 - y2) ** 2)
    assert abs(float(loss2) - float(ref2)) < 1e-4 * max(1.0, abs(float(ref2))), (
        float(loss2), float(ref2))

    # bf16 path exercises native-dtype streaming with a different tile target.
    xb = x.astype(jnp.bfloat16)
    yb = y.astype(jnp.bfloat16)
    loss3 = jax.block_until_ready(mse_loss_pallas(xb, yb, reduction="mean"))
    ref3 = jnp.mean((xb.astype(jnp.float32) - yb.astype(jnp.float32)) ** 2)
    assert abs(float(loss3) - float(ref3)) < 5e-3 * max(1.0, abs(float(ref3))), (
        float(loss3), float(ref3))

    print("KERNEL_OK")
</pallas_src>

<mosaic_0001>
module attributes {stable_mosaic.version = 11 : i64} {
  func.func @kernel(%arg0: i32, %arg1: i32, %arg2: memref<32x128xf32, #tpu.memory_space<vmem>>, %arg3: memref<32x128xf32, #tpu.memory_space<vmem>>, %arg4: memref<32x128xf32, #tpu.memory_space<vmem>>) attributes {dimension_semantics = [#tpu.dimension_semantics<parallel>, #tpu.dimension_semantics<arbitrary>], iteration_bounds = array<i64: 1, 1>, scalar_prefetch = 0 : i64, scratch_operands = 0 : i64, tpu.core_type = #tpu.core_type<tc>, window_params = [{transform_indices = @transform_0, window_bounds = array<i64: 32, 128>}, {transform_indices = @transform_1, window_bounds = array<i64: 32, 128>}, {transform_indices = @transform_2, window_bounds = array<i64: 32, 128>}]} {
    %c1_i32 = arith.constant 1 : i32
    %0 = arith.muli %arg0, %c1_i32 : i32
    %1 = arith.addi %0, %arg1 : i32
    %c0_i32 = arith.constant 0 : i32
    %2 = arith.cmpi eq, %arg1, %c0_i32 : i32
    %3 = arith.extui %2 : i1 to i32
    %c0_i32_0 = arith.constant 0 : i32
    %4 = arith.cmpi ne, %3, %c0_i32_0 : i32
    scf.if %4 {
      %cst_10 = arith.constant 0.000000e+00 : f32
      %23 = vector.broadcast %cst_10 : f32 to vector<32x128xf32>
      %c0_11 = arith.constant 0 : index
      %c0_12 = arith.constant 0 : index
      %24 = vector.load %arg4[%c0_11, %c0_12] : memref<32x128xf32, #tpu.memory_space<vmem>>, vector<32x128xf32>
      tpu.vector_store %arg4[%c0_11, %c0_12], %23 {strides = array<i32>} : memref<32x128xf32, #tpu.memory_space<vmem>>, vector<32x128xf32>,
    } else {
    }
    %c0 = arith.constant 0 : index
    %c0_1 = arith.constant 0 : index
    %5 = vector.load %arg2[%c0, %c0_1] : memref<32x128xf32, #tpu.memory_space<vmem>>, vector<32x128xf32>
    %c0_2 = arith.constant 0 : index
    %c0_3 = arith.constant 0 : index
    %6 = vector.load %arg3[%c0_2, %c0_3] : memref<32x128xf32, #tpu.memory_space<vmem>>, vector<32x128xf32>
    %7 = arith.subf %5, %6 : vector<32x128xf32>
    %c32_i32 = arith.constant 32 : i32
    %8 = arith.muli %1, %c32_i32 : i32
    %c0_i32_4 = arith.constant 0 : i32
    %9 = arith.addi %8, %c0_i32_4 : i32
    %10 = tpu.iota {dimensions = array<i32: 0>} : vector<32x128xi32>
    %11 = vector.broadcast %9 : i32 to vector<32x128xi32>
    %12 = arith.addi %11, %10 : vector<32x128xi32>
    %c16_i32 = arith.constant 16 : i32
    %13 = vector.broadcast %c16_i32 : i32 to vector<32x128xi32>
    %14 = arith.cmpi slt, %12, %13 : vector<32x128xi32>
    %cst = arith.constant 0.000000e+00 : f32
    %15 = vector.broadcast %cst : f32 to vector<32x128xf32>
    %16 = arith.select %14, %7, %15 : vector<32x128xi1>, vector<32x128xf32>
    %17 = arith.mulf %16, %16 : vector<32x128xf32>
    %18 = vector.shape_cast %17 : vector<32x128xf32> to vector<1x32x128xf32>
    %cst_5 = arith.constant dense<0.000000e+00> : vector<32x128xf32>
    %19 = vector.multi_reduction <add>, %18, %cst_5 [0] : vector<1x32x128xf32> to vector<32x128xf32>
    %c0_6 = arith.constant 0 : index
    %c0_7 = arith.constant 0 : index
    %20 = vector.load %arg4[%c0_6, %c0_7] : memref<32x128xf32, #tpu.memory_space<vmem>>, vector<32x128xf32>
    %21 = arith.addf %20, %19 : vector<32x128xf32>
    %c0_8 = arith.constant 0 : index
    %c0_9 = arith.constant 0 : index
    %22 = vector.load %arg4[%c0_8, %c0_9] : memref<32x128xf32, #tpu.memory_space<vmem>>, vector<32x128xf32>
    tpu.vector_store %arg4[%c0_8, %c0_9], %21 {strides = array<i32>} : memref<32x128xf32, #tpu.memory_space<vmem>>, vector<32x128xf32>,
    return
  }
  func.func @transform_0(%arg0: i32, %arg1: i32) -> (i32, i32) {
    %c1_i32 = arith.constant 1 : i32
    %0 = arith.muli %arg0, %c1_i32 : i32
    %1 = arith.addi %0, %arg1 : i32
    %c0_i32 = arith.constant 0 : i32
    %2 = arith.minsi %1, %c0_i32 : i32
    %c0_i32_0 = arith.constant 0 : i32
    %c0_i32_1 = arith.constant 0 : i32
    return %2, %c0_i32_0 : i32, i32
  }
  func.func @transform_1(%arg0: i32, %arg1: i32) -> (i32, i32) {
    %c1_i32 = arith.constant 1 : i32
    %0 = arith.muli %arg0, %c1_i32 : i32
    %1 = arith.addi %0, %arg1 : i32
    %c0_i32 = arith.constant 0 : i32
    %2 = arith.minsi %1, %c0_i32 : i32
    %c0_i32_0 = arith.constant 0 : i32
    %c0_i32_1 = arith.constant 0 : i32
    return %2, %c0_i32_0 : i32, i32
  }
  func.func @transform_2(%arg0: i32, %arg1: i32) -> (i32, i32) {
    %c0_i32 = arith.constant 0 : i32
    %c0_i32_0 = arith.constant 0 : i32
    return %arg0, %c0_i32 : i32, i32
  }
}

</mosaic_0001>

<bundles_post_ra>
// kernel: tpu_custom_call.1
= control target key start
LH: loop header
LB: loop body
LE: loop exit
PB: predicated region body
PF: predicated region fallthrough
CT: control target
= control target key end

     0   :  { %7 = vsyncpa [#allocation3], 0  ;;  %s298_s0 = inlined_call_operand.hbm [shape: f32[16,128], index: 0, kind: input, shape index: {}]   ;;  %s299_s1 = inlined_call_operand.hbm [shape: f32[16,128], index: 1, kind: input, shape index: {}]   ;;  %s300_s2 = inlined_call_operand.hbm [shape: f32[32,128], index: 2, kind: output, shape index: {}]  }
   0x1   :  { %8 = vsyncpa [#allocation6], 0 }
   0x2   :  { %9 = vsyncpa [#allocation4], 0 }
   0x3   :  { %20 = vsyncadd [#allocation3], 256  ;;  %s232_s9 = smov [#allocation2]   ;;  %s160_s13 = scalar_lea.hbm %s298_s0, 256 }
   0x4   :  { %s25_s10 = sshll.u32 %s232_s9, 4  ;;  %p161_p0 = scmp.ne.s32.totalorder %s298_s0, %s160_s13  ;;  %s26_s10 = int_to_ptr.vmem [resolvable:$true] %s25_s10 }
   0x5   :  { %p164_p1 = scmp.lt.u32.totalorder %s160_s13, %s298_s0 }
   0x7   :  { %p166_p2 = pnand %p164_p1, %p161_p0 }
   0x9   :  { %169 = shalt.err (!%p166_p2)
}
   0xa   :  { %s170_s18 = scalar_lea.vmem %s26_s10, 256  ;;  %s174_s19 = scalar_lea.vmem %s26_s10, 512 }
   0xb   :  { %p171_p3 = scmp.ne.s32.totalorder %s26_s10, %s170_s18  ;;  %p175_p4 = scmp.lt.s32.totalorder %s26_s10, %s26_s10 }
   0xc   :  { %p176_p5 = scmp.lt.s32.totalorder %s174_s19, %s170_s18 }
   0xe   :  { %p177_p6 = por %p176_p5, %p175_p4 }
  0x10   :  { %p178_p7 = pnand %p177_p6, %p171_p3 }
  0x12   :  { %181 = shalt.err (!%p178_p7)
}
  0x13   :  { %s233_s20 = smov 128   ;;  %s234_s21 = smov 8  }
  0x14   :  { %31 = dma.hbm_to_vmem [thread:$0]  %s298_s0, 256, %s26_s10, [#allocation3], %s233_s20, %s233_s20, %s234_s21  }
  0x15   :  { %42 = vsyncadd [#allocation6], 256  ;;  %s235_s24 = smov [#allocation5]   ;;  %s182_s28 = scalar_lea.hbm %s299_s1, 256 }
  0x16   :  { %s47_s25 = sshll.u32 %s235_s24, 4  ;;  %p183_p8 = scmp.ne.s32.totalorder %s299_s1, %s182_s28  ;;  %s48_s25 = int_to_ptr.vmem [resolvable:$true] %s47_s25 }
  0x17   :  { %p186_p9 = scmp.lt.u32.totalorder %s182_s28, %s299_s1 }
  0x19   :  { %p188_p10 = pnand %p186_p9, %p183_p8 }
  0x1b   :  { %191 = shalt.err (!%p188_p10)
}
  0x1c   :  { %s192_s5 = scalar_lea.vmem %s48_s25, 256  ;;  %s196_s0 = scalar_lea.vmem %s48_s25, 512 }
  0x1d   :  { %p193_p11 = scmp.ne.s32.totalorder %s48_s25, %s192_s5  ;;  %p197_p12 = scmp.lt.s32.totalorder %s48_s25, %s48_s25 }
  0x1e   :  { %p198_p13 = scmp.lt.s32.totalorder %s196_s0, %s192_s5 }
  0x20   :  { %p199_p0 = por %p198_p13, %p197_p12 }
  0x22   :  { %p200_p1 = pnand %p199_p0, %p193_p11 }
  0x24   :  { %203 = shalt.err (!%p200_p1)
}
  0x25   :  { %53 = dma.hbm_to_vmem [thread:$0]  %s299_s1, 256, %s48_s25, [#allocation6], %s233_s20, %s233_s20, %s234_s21  }
  0x26   :  { %226 = dma.done.wait [#allocation3], 512  }
  0x27   :  { %227 = vsyncadd [#allocation3], 4294966784 }
  0x28   :  { %228 = dma.done.wait [#allocation6], 512  }
  0x29   :  { %229 = vsyncadd [#allocation6], 4294966784  ;;  %v236_v0 = vmov 0.0   ;;  %v81_v1 = vld [vmem:[#allocation2] sm:$0xff]  ;;  %v82_v3 = vld [vmem:[#allocation2 + $0x8] sm:$0xff]  ;;  %s237_s8 = smov [#allocation7]  }
  0x2a   :  { %130 = vst [vmem:[#allocation7 + $0x10] sm:$0xff] %v236_v0  ;;  %131 = vst [vmem:[#allocation7 + $0x18] sm:$0xff] %v236_v0  ;;  %v85_v2 = vld [vmem:[#allocation5] sm:$0xff]  ;;  %v86_v5 = vld [vmem:[#allocation5 + $0x8] sm:$0xff]  ;;  %s137_s9 = sshll.u32 %s237_s8, 4  ;;  %s138_s9 = int_to_ptr.vmem [resolvable:$true] %s137_s9 }
  0x2b   :  { %v89_v4 = vsub.f32 %v81_v1, %v85_v2  ;;  %v90_v6 = vsub.f32 %v82_v3, %v86_v5  ;;  %s204_s1 = scalar_lea.vmem %s138_s9, 512  ;;  %p209_p3 = scmp.lt.s32.totalorder %s138_s9, %s138_s9 }
  0x2c   :  { %p205_p2 = scmp.ne.s32.totalorder %s138_s9, %s204_s1  ;;  %p210_p4 = scmp.lt.s32.totalorder %s204_s1, %s204_s1 }
  0x2d   :  { %v112_v7 = vmul.f32 %v89_v4, %v89_v4  ;;  %v113_v8 = vmul.f32 %v90_v6, %v90_v6 }
  0x2e   :  { %p211_p5 = por %p210_p4, %p209_p3 }
  0x2f   :  { %128 = vst [vmem:[#allocation7] sm:$0xff] %v112_v7  ;;  %129 = vst [vmem:[#allocation7 + $0x8] sm:$0xff] %v113_v8 }
  0x30   :  { %p212_p6 = pnand %p211_p5, %p205_p2 }
  0x32   :  { %215 = shalt.err (!%p212_p6)
}
  0x33   :  { %s216_s12 = scalar_lea.hbm %s300_s2, 512 }
  0x34   :  { %p217_p7 = scmp.ne.s32.totalorder %s300_s2, %s216_s12  ;;  %p220_p8 = scmp.lt.u32.totalorder %s216_s12, %s300_s2 }
  0x36   :  { %p222_p9 = pnand %p220_p8, %p217_p7 }
  0x38   :  { %225 = shalt.err (!%p222_p9)
}
  0x39   :  { %143 = dma.vmem_to_hbm [thread:$0]  %s138_s9, 512, %s300_s2, [#allocation4], %s233_s20, %s233_s20, %s234_s21  }
  0x3a   :  { %230 = dma.done.wait [#allocation4], 512  }
  0x3b   :  { %231 = vsyncadd [#allocation4], 4294966784 }
  0x3c   :  { %147 = vsyncpa [#allocation3], 1 }
  0x3d   :  { %148 = vsyncpa [#allocation6], 1 }
  0x3e   :  { %149 = vsyncpa [#allocation4], 1 }

</bundles_post_ra>
